<compile_context>
chip_gen: v5e
topology: v5e:2x2
jax: 0.10.0
libtpu: 0.0.40
codegen_flags: <defaults>
</compile_context>

<pallas_src>
import functools
import math

import jax
import jax.numpy as jnp
from jax import lax
from jax.experimental import pallas as pl
from jax.experimental.pallas import tpu as pltpu


def _round_up(x: int, m: int) -> int:
    return (x + m - 1) // m * m


def _vmem_capacity_bytes() -> int:
    """Physical VMEM per TensorCore; conservative (v7x) fallback."""
    try:
        return int(pltpu.get_tpu_info().vmem_capacity_bytes)
    except Exception:
        return 64 << 20  # v7x has the smallest VMEM (64 MiB / TC)


# Vocabularies at or below this size use the one-hot MXU gather.
_ONE_HOT_MAX_V = 4096
# Cap on the (T, V) one-hot intermediate.
_ONE_HOT_MAX_BYTES = 2 << 20
# Below this table size the resident path is always cheap enough; the
# traffic-based selector only kicks in for larger tables.
_TRAFFIC_SELECT_MIN_TABLE = 4 << 20
# Rows gathered per grid step on the huge-table manual-DMA fallback.
_GATHER_ROWS_PER_BLOCK = 16


# ---------------------------------------------------------------------------
# Kernel 1: VMEM-resident table, one-hot MXU gather, T tokens per grid step.
# ---------------------------------------------------------------------------
def _embed_onehot_kernel(ids_ref, w_ref, o_ref, *, block_tokens):
    # ids_ref : (T, 1)  int32 VMEM block (token ids along sublanes)
    # w_ref   : (V, D)  VMEM tile = full embedding table (constant index_map
    #           -> resident across grid steps)
    # o_ref   : (T, D)  VMEM output tile
    V = w_ref.shape[0]
    ids = ids_ref[...]                                           # (T, 1)
    vocab_iota = lax.broadcasted_iota(jnp.int32, (block_tokens, V), 1)
    onehot = (vocab_iota == ids).astype(w_ref.dtype)             # (T, V)
    o_ref[...] = jnp.dot(
        onehot, w_ref[...], preferred_element_type=jnp.float32
    ).astype(o_ref.dtype)


# ---------------------------------------------------------------------------
# Kernel 2: VMEM-resident table, vectorized dynamic gather (larger vocab).
# ---------------------------------------------------------------------------
def _embed_take_kernel(ids_ref, w_ref, o_ref):
    ids = ids_ref[:, 0]                                          # (T,)
    o_ref[...] = jnp.take(w_ref[...], ids, axis=0, mode="clip").astype(
        o_ref.dtype)


# ---------------------------------------------------------------------------
# Kernel 3 (huge tables): blocked manual-DMA row gather from HBM.
# ---------------------------------------------------------------------------
def _embed_dma_gather_kernel(ids_ref, w_hbm, o_ref, rows_vmem, sems,
                             *, rows_per_block):
    # ids_ref  : SMEM scalar-prefetch ref with all (padded) token ids
    # w_hbm    : (V, D) HBM ref (memory_space=pl.ANY)
    # o_ref    : (R, D) VMEM output tile
    # rows_vmem: (R, D) VMEM scratch, sems: (R,) DMA semaphores
    base = pl.program_id(0) * rows_per_block

    # Issue all row DMAs for this block up front so they overlap.
    for r in range(rows_per_block):
        row = ids_ref[base + r]
        pltpu.make_async_copy(
            w_hbm.at[pl.ds(row, 1), :],
            rows_vmem.at[pl.ds(r, 1), :],
            sems.at[r],
        ).start()
    for r in range(rows_per_block):
        row = ids_ref[base + r]
        pltpu.make_async_copy(
            w_hbm.at[pl.ds(row, 1), :],
            rows_vmem.at[pl.ds(r, 1), :],
            sems.at[r],
        ).wait()
    o_ref[...] = rows_vmem[...]


# ---------------------------------------------------------------------------
# Wrapper
# ---------------------------------------------------------------------------
def embedding_lookup(weight: jax.Array, x: jax.Array,
                     *, tokens_per_block: int = 512) -> jax.Array:
    """weight: [V, D]; x: int array of any shape -> x.shape + (D,)."""
    V, D = weight.shape
    orig_shape = x.shape
    n_tok = math.prod(orig_shape)
    if n_tok == 0:
        return jnp.zeros((*orig_shape, D), weight.dtype)

    # Pad the embedding width to a multiple of 128 lanes.
    D_pad = _round_up(D, 128)
    w = weight if D_pad == D else jnp.pad(weight, ((0, 0), (0, D_pad - D)))

    itemsize = jnp.dtype(weight.dtype).itemsize
    table_bytes = V * D_pad * itemsize
    gathered_bytes = n_tok * D_pad * itemsize

    # Clamp out-of-range ids (defined behavior instead of silent OOB reads).
    flat_ids = jnp.clip(x.reshape(-1).astype(jnp.int32), 0, V - 1)

    vmem_cap = _vmem_capacity_bytes()
    # Double-buffered resident table + output/ids tiles must fit VMEM.
    resident_budget = vmem_cap // 3

    # Traffic-based selector: for large tables and short sequences, gathering
    # the rows directly from HBM moves far less data than streaming the table.
    prefer_gather = (table_bytes > _TRAFFIC_SELECT_MIN_TABLE
                     and 4 * gathered_bytes < table_bytes)

    if table_bytes <= resident_budget and not prefer_gather:
        # -------------------- resident-table vectorized path --------------
        use_onehot = V <= _ONE_HOT_MAX_V
        if use_onehot:
            t_cap = max(8, (_ONE_HOT_MAX_BYTES // (V * 4)) // 8 * 8)
            t_target = min(tokens_per_block, t_cap)
        else:
            t_target = tokens_per_block
        T = max(8, min(t_target, _round_up(n_tok, 8)))
        T = _round_up(T, 8)
        n_pad = _round_up(n_tok, T)
        if n_pad != n_tok:
            flat_ids = jnp.concatenate(
                [flat_ids, jnp.zeros((n_pad - n_tok,), jnp.int32)])
        ids_2d = flat_ids.reshape(n_pad, 1)

        out_tile_bytes = T * D_pad * itemsize
        ids_tile_bytes = T * 128 * 4            # (T, 1) i32, lane-padded
        onehot_bytes = T * max(V, 128) * 4 if use_onehot else 0
        acc_bytes = T * D_pad * 4               # f32 matmul result
        vmem_needed = (2 * table_bytes + 2 * out_tile_bytes
                       + 2 * ids_tile_bytes + onehot_bytes + acc_bytes
                       + (16 << 20))
        vmem_limit = int(min(max(vmem_needed, 32 << 20), vmem_cap - (4 << 20)))

        if use_onehot:
            kernel = functools.partial(_embed_onehot_kernel, block_tokens=T)
        else:
            kernel = _embed_take_kernel

        out_padded = pl.pallas_call(
            kernel,
            out_shape=jax.ShapeDtypeStruct((n_pad, D_pad), weight.dtype),
            grid=(n_pad // T,),
            in_specs=[
                pl.BlockSpec((T, 1), lambda i: (i, 0)),
                # Constant block index -> table DMA'd once, stays resident.
                pl.BlockSpec((V, D_pad), lambda i: (0, 0)),
            ],
            out_specs=pl.BlockSpec((T, D_pad), lambda i: (i, 0)),
            compiler_params=pltpu.CompilerParams(
                # Independent token blocks -> shardable across v7x's 2 TCs.
                # (Each TC holds its own table copy; fine once per-TC token
                # work exceeds the table load.)
                dimension_semantics=("parallel",),
                vmem_limit_bytes=vmem_limit,
            ),
        )(ids_2d, w)
        out_flat = out_padded[:n_tok] if n_pad != n_tok else out_padded
    else:
        # ---------------- huge-table blocked manual-DMA gather -------------
        R = _GATHER_ROWS_PER_BLOCK
        n_pad = _round_up(n_tok, R)
        if n_pad != n_tok:
            flat_ids = jnp.concatenate(
                [flat_ids, jnp.zeros((n_pad - n_tok,), jnp.int32)])

        out_padded = pl.pallas_call(
            functools.partial(_embed_dma_gather_kernel, rows_per_block=R),
            out_shape=jax.ShapeDtypeStruct((n_pad, D_pad), weight.dtype),
            grid_spec=pltpu.PrefetchScalarGridSpec(
                num_scalar_prefetch=1,
                grid=(n_pad // R,),
                in_specs=[pl.BlockSpec(memory_space=pl.ANY)],
                out_specs=pl.BlockSpec((R, D_pad), lambda i, ids: (i, 0)),
                scratch_shapes=[
                    pltpu.VMEM((R, D_pad), weight.dtype),
                    pltpu.SemaphoreType.DMA((R,)),
                ],
            ),
            compiler_params=pltpu.CompilerParams(
                dimension_semantics=("arbitrary",),
            ),
        )(flat_ids, w)
        out_flat = out_padded[:n_tok] if n_pad != n_tok else out_padded

    if D_pad != D:
        out_flat = out_flat[:, :D]
    return out_flat.reshape(*orig_shape, D)


def make_embedding_weight(key, num_embeddings: int, embedding_dim: int) -> jax.Array:
    # Matches nn.init.xavier_uniform_ on a [V, D] weight:
    # bound = sqrt(6 / (fan_in + fan_out))
    bound = (6.0 / (num_embeddings + embedding_dim)) ** 0.5
    return jax.random.uniform(
        key, (num_embeddings, embedding_dim), dtype=jnp.float32,
        minval=-bound, maxval=bound,
    )


if __name__ == "__main__":
    key = jax.random.PRNGKey(0)
    k_w, k_x1, k_x2 = jax.random.split(key, 3)

    num_embeddings = 256   # vocabulary size
    embedding_dim = 128    # lane-aligned embedding width

    weight = make_embedding_weight(k_w, num_embeddings, embedding_dim)

    # Check 1: small batch/seq (single token block).
    x1 = jax.random.randint(k_x1, (2, 8), 0, num_embeddings, dtype=jnp.int32)
    out1 = jax.block_until_ready(embedding_lookup(weight, x1))
    assert out1.shape == (2, 8, embedding_dim)
    assert jnp.allclose(out1, weight[x1]), "mismatch vs reference gather (check 1)"

    # Check 2: token count not a multiple of 8*block sizes (exercises padding).
    x2 = jax.random.randint(k_x2, (4, 50), 0, num_embeddings, dtype=jnp.int32)
    out2 = jax.block_until_ready(embedding_lookup(weight, x2))
    assert out2.shape == (4, 50, embedding_dim)
    assert jnp.allclose(out2, weight[x2]), "mismatch vs reference gather (check 2)"

    print("KERNEL_OK")
</pallas_src>

<mosaic_0001>
module attributes {stable_mosaic.version = 11 : i64} {
  func.func @_embed_onehot_kernel(%arg0: i32, %arg1: memref<16x1xi32, #tpu.memory_space<vmem>>, %arg2: memref<256x128xf32, #tpu.memory_space<vmem>>, %arg3: memref<16x128xf32, #tpu.memory_space<vmem>>) attributes {dimension_semantics = [#tpu.dimension_semantics<parallel>], iteration_bounds = array<i64: 1>, scalar_prefetch = 0 : i64, scratch_operands = 0 : i64, tpu.core_type = #tpu.core_type<tc>, window_params = [{transform_indices = @transform_0, window_bounds = array<i64: 16, 1>}, {pipeline_mode = #tpu.pipeline_mode<synchronous>, transform_indices = @transform_1, window_bounds = array<i64: 256, 128>}, {transform_indices = @transform_2, window_bounds = array<i64: 16, 128>}]} {
    %c0 = arith.constant 0 : index
    %c0_0 = arith.constant 0 : index
    %0 = vector.load %arg1[%c0, %c0_0] : memref<16x1xi32, #tpu.memory_space<vmem>>, vector<16x1xi32>
    %1 = tpu.iota {dimensions = array<i32: 1>} : vector<16x256xi32>
    %2 = vector.broadcast %0 : vector<16x1xi32> to vector<16x256xi32>
    %3 = arith.cmpi eq, %1, %2 : vector<16x256xi32>
    %4 = arith.extui %3 : vector<16x256xi1> to vector<16x256xi32>
    %5 = arith.sitofp %4 : vector<16x256xi32> to vector<16x256xf32>
    %c0_1 = arith.constant 0 : index
    %c0_2 = arith.constant 0 : index
    %6 = vector.load %arg2[%c0_1, %c0_2] : memref<256x128xf32, #tpu.memory_space<vmem>>, vector<256x128xf32>
    %cst = arith.constant dense<0.000000e+00> : vector<16x128xf32>
    %7 = tpu.matmul %5, %6, %cst {dimension_numbers = #tpu.dot_dimension_numbers<[1], [0], [0], [1], [0, 0, 1, 1], [], []>} : vector<16x256xf32>, vector<256x128xf32>, vector<16x128xf32> -> vector<16x128xf32>
    %c0_3 = arith.constant 0 : index
    %c0_4 = arith.constant 0 : index
    %8 = vector.load %arg3[%c0_3, %c0_4] : memref<16x128xf32, #tpu.memory_space<vmem>>, vector<16x128xf32>
    tpu.vector_store %arg3[%c0_3, %c0_4], %7 {strides = array<i32>} : memref<16x128xf32, #tpu.memory_space<vmem>>, vector<16x128xf32>,
    return
  }
  func.func @transform_0(%arg0: i32) -> (i32, i32) {
    %c0_i32 = arith.constant 0 : i32
    %c0_i32_0 = arith.constant 0 : i32
    return %arg0, %c0_i32 : i32, i32
  }
  func.func @transform_1(%arg0: i32) -> (i32, i32) {
    %c0_i32 = arith.constant 0 : i32
    %c0_i32_0 = arith.constant 0 : i32
    %c0_i32_1 = arith.constant 0 : i32
    return %c0_i32, %c0_i32_0 : i32, i32
  }
  func.func @transform_2(%arg0: i32) -> (i32, i32) {
    %c0_i32 = arith.constant 0 : i32
    %c0_i32_0 = arith.constant 0 : i32
    return %arg0, %c0_i32 : i32, i32
  }
}

</mosaic_0001>

<bundles_post_ra>
// kernel: tpu_custom_call.1
= control target key start
LH: loop header
LB: loop body
LE: loop exit
PB: predicated region body
PF: predicated region fallthrough
CT: control target
= control target key end

     0   :  { %7 = vsyncpa [#allocation3], 0  ;;  %s288_s0 = inlined_call_operand.vmem [shape: s32[16,1], index: 0, kind: input, shape index: {}]   ;;  %s289_s1 = inlined_call_operand.hbm [shape: f32[256,128], index: 1, kind: input, shape index: {}]   ;;  %s290_s2 = inlined_call_operand.hbm [shape: f32[16,128], index: 2, kind: output, shape index: {}]  }
   0x1   :  { %8 = vsyncpa [#allocation4], 0  ;;  %s15_s11 = sshll.u32 %s289_s1, 4  ;;  %s249_s12 = smov [#allocation2]   ;;  %s16_s11 = int_to_ptr.hbm [resolvable:$true] %s15_s11 }
   0x2   :  { %s17_s13 = sshll.u32 %s249_s12, 4  ;;  %s250_s14 = smov 128   ;;  %s18_s13 = int_to_ptr.vmem [resolvable:$true] %s17_s13 }
   0x3   :  { %s251_s15 = smov 8  }
   0x4   :  { %23 = dma.hbm_to_vmem [thread:$0]  %s16_s11, 4096, %s18_s13, [#allocation3], %s250_s14, %s250_s14, %s251_s15  }
   0x5   :  { %245 = dma.done.wait [#allocation3], 4096  }
   0x6   :  { %246 = vsyncadd [#allocation3], 4294963200  ;;  %v252_v0 = vmov 0   ;;  %v29_v1 = vld [vmem:[%s288_s0 + $0x8] sm:$0xff]  ;;  %v66_v2 = vld [vmem:[#allocation2 + $0x78] sm:$0xff]  ;;  %v30_v35 = vlaneseq  ;;  %v253_v39 = vmov 1.0  }
   0x7   :  { %196 = vset.pattern.permute.xlu0 %v252_v0  ;;  %158 = vmatpush.msra.mxu2 %v66_v2  ;;  %v82_v3 = vld [vmem:[#allocation2 + $0xf8] sm:$0xff]  ;;  %v65_v4 = vld [vmem:[#allocation2 + $0x70] sm:$0xff]  ;;  %v64_v6 = vld [vmem:[#allocation2 + $0x68] sm:$0xff]  ;;  %s137_s22 = sshll.u32 %s290_s2, 4  ;;  %s138_s22 = int_to_ptr.hbm [resolvable:$true] %s137_s22 }
   0x8   :  { %37 = vperm.xlu0 %196, %v29_v1   ;;  %v81_v5 = vld [vmem:[#allocation2 + $0xf0] sm:$0xff]  ;;  %174 = vmatpush.msra.mxu3 %v82_v3  ;;  %v80_v7 = vld [vmem:[#allocation2 + $0xe8] sm:$0xff]  ;;  %v63_v8 = vld [vmem:[#allocation2 + $0x60] sm:$0xff]  ;;  %v31_v36 = vand.u32 127, %v30_v35 }
   0x9   :  { %83 = vmatpush.msra.mxu0 %v66_v2  ;;  %159 = vmatpush.msra.mxu2 %v65_v4  ;;  %v79_v9 = vld [vmem:[#allocation2 + $0xe0] sm:$0xff]  ;;  %v62_v11 = vld [vmem:[#allocation2 + $0x58] sm:$0xff]  ;;  %v61_v13 = vld [vmem:[#allocation2 + $0x50] sm:$0xff] }
   0xa   :  { %106 = vmatpush.msra.mxu1 %v82_v3  ;;  %175 = vmatpush.msra.mxu3 %v81_v5  ;;  %v28_v10 = vld [vmem:[%s288_s0] sm:$0xff]  ;;  %v78_v12 = vld [vmem:[#allocation2 + $0xd8] sm:$0xff]  ;;  %v77_v14 = vld [vmem:[#allocation2 + $0xd0] sm:$0xff]  ;;  %v32_v37 = vadd.s32 128, %v31_v36  ;;  %s254_s0 = smov [#allocation5]  }
   0xb   :  { %84 = vmatpush.msra.mxu0 %v65_v4  ;;  %160 = vmatpush.msra.mxu2 %v64_v6  ;;  %v60_v15 = vld [vmem:[#allocation2 + $0x48] sm:$0xff]  ;;  %v59_v17 = vld [vmem:[#allocation2 + $0x40] sm:$0xff]  ;;  %v58_v19 = vld [vmem:[#allocation2 + $0x38] sm:$0xff]  ;;  %s135_s19 = sshll.u32 %s254_s0, 4  ;;  %s136_s19 = int_to_ptr.vmem [resolvable:$true] %s135_s19 }
   0xc   :  { %107 = vmatpush.msra.mxu1 %v81_v5  ;;  %176 = vmatpush.msra.mxu3 %v80_v7  ;;  %v76_v16 = vld [vmem:[#allocation2 + $0xc8] sm:$0xff]  ;;  %v75_v18 = vld [vmem:[#allocation2 + $0xc0] sm:$0xff]  ;;  %v74_v20 = vld [vmem:[#allocation2 + $0xb8] sm:$0xff] }
   0xd   :  { %85 = vmatpush.msra.mxu0 %v64_v6  ;;  %161 = vmatpush.msra.mxu2 %v63_v8  ;;  %v57_v21 = vld [vmem:[#allocation2 + $0x30] sm:$0xff]  ;;  %v56_v23 = vld [vmem:[#allocation2 + $0x28] sm:$0xff]  ;;  %v55_v25 = vld [vmem:[#allocation2 + $0x20] sm:$0xff] }
   0xe   :  { %108 = vmatpush.msra.mxu1 %v80_v7  ;;  %177 = vmatpush.msra.mxu3 %v79_v9  ;;  %v73_v22 = vld [vmem:[#allocation2 + $0xb0] sm:$0xff]  ;;  %v72_v24 = vld [vmem:[#allocation2 + $0xa8] sm:$0xff]  ;;  %v71_v26 = vld [vmem:[#allocation2 + $0xa0] sm:$0xff] }
   0xf   :  { %86 = vmatpush.msra.mxu0 %v63_v8  ;;  %162 = vmatpush.msra.mxu2 %v62_v11  ;;  %v54_v27 = vld [vmem:[#allocation2 + $0x18] sm:$0xff]  ;;  %v53_v29 = vld [vmem:[#allocation2 + $0x10] sm:$0xff]  ;;  %v52_v31 = vld [vmem:[#allocation2 + $0x8] sm:$0xff] }
  0x10   :  { %34 = vperm.xlu0 %196, %v28_v10   ;;  %178 = vmatpush.msra.mxu3 %v78_v12  ;;  %v70_v28 = vld [vmem:[#allocation2 + $0x98] sm:$0xff]  ;;  %v69_v30 = vld [vmem:[#allocation2 + $0x90] sm:$0xff]  ;;  %v68_v32 = vld [vmem:[#allocation2 + $0x88] sm:$0xff] }
  0x11   :  { %109 = vmatpush.msra.mxu1 %v79_v9  ;;  %163 = vmatpush.msra.mxu2 %v61_v13  ;;  %v51_v33 = vld [vmem:[#allocation2] sm:$0xff] }
  0x12   :  { %87 = vmatpush.msra.mxu0 %v62_v11  ;;  %179 = vmatpush.msra.mxu3 %v77_v14  ;;  %v67_v34 = vld [vmem:[#allocation2 + $0x80] sm:$0xff] }
  0x13   :  { %110 = vmatpush.msra.mxu1 %v78_v12  ;;  %164 = vmatpush.msra.mxu2 %v60_v15 }
  0x14   :  { %88 = vmatpush.msra.mxu0 %v61_v13  ;;  %180 = vmatpush.msra.mxu3 %v76_v16 }
  0x15   :  { %111 = vmatpush.msra.mxu1 %v77_v14  ;;  %165 = vmatpush.msra.mxu2 %v59_v17 }
  0x16   :  { %89 = vmatpush.msra.mxu0 %v60_v15  ;;  %181 = vmatpush.msra.mxu3 %v75_v18 }
  0x17   :  { %112 = vmatpush.msra.mxu1 %v76_v16  ;;  %166 = vmatpush.msra.mxu2 %v58_v19 }
  0x18   :  { %90 = vmatpush.msra.mxu0 %v59_v17  ;;  %182 = vmatpush.msra.mxu3 %v74_v20 }
  0x19   :  { %113 = vmatpush.msra.mxu1 %v75_v18  ;;  %167 = vmatpush.msra.mxu2 %v57_v21 }
  0x1a   :  { %91 = vmatpush.msra.mxu0 %v58_v19  ;;  %183 = vmatpush.msra.mxu3 %v73_v22 }
  0x1b   :  { %114 = vmatpush.msra.mxu1 %v74_v20  ;;  %168 = vmatpush.msra.mxu2 %v56_v23 }
  0x1c   :  { %92 = vmatpush.msra.mxu0 %v57_v21  ;;  %184 = vmatpush.msra.mxu3 %v72_v24 }
  0x1d   :  { %115 = vmatpush.msra.mxu1 %v73_v22  ;;  %169 = vmatpush.msra.mxu2 %v55_v25 }
  0x1e   :  { %93 = vmatpush.msra.mxu0 %v56_v23  ;;  %185 = vmatpush.msra.mxu3 %v71_v26 }
  0x1f   :  { %116 = vmatpush.msra.mxu1 %v72_v24  ;;  %170 = vmatpush.msra.mxu2 %v54_v27 }
  0x20   :  { %94 = vmatpush.msra.mxu0 %v55_v25  ;;  %186 = vmatpush.msra.mxu3 %v70_v28 }
  0x21   :  { %117 = vmatpush.msra.mxu1 %v71_v26  ;;  %171 = vmatpush.msra.mxu2 %v53_v29 }
  0x22   :  { %95 = vmatpush.msra.mxu0 %v54_v27  ;;  %187 = vmatpush.msra.mxu3 %v69_v30 }
  0x23   :  { %118 = vmatpush.msra.mxu1 %v70_v28  ;;  %172 = vmatpush.msra.mxu2 %v52_v31 }
  0x24   :  { %96 = vmatpush.msra.mxu0 %v53_v29  ;;  %188 = vmatpush.msra.mxu3 %v68_v32 }
  0x25   :  { %119 = vmatpush.msra.mxu1 %v69_v30  ;;  %173 = vmatpush.msra.mxu2 %v51_v33 }
  0x26   :  { %97 = vmatpush.msra.mxu0 %v52_v31  ;;  %189 = vmatpush.msra.mxu3 %v67_v34 }
  0x27   :  { %120 = vmatpush.msra.mxu1 %v68_v32 }
  0x28   :  { %98 = vmatpush.msra.mxu0 %v51_v33 }
  0x29   :  { %121 = vmatpush.msra.mxu1 %v67_v34 }
  0x7a   :  { %v38_v38 = vpop.permute.xlu0 %37 }
  0x7b   :  { %vm41_vm0 = vcmp.eq.s32.totalorder %v31_v36, %v38_v38  ;;  %vm42_vm1 = vcmp.eq.s32.totalorder %v32_v37, %v38_v38 }
  0x7c   :  { %155 = vmatmul.msk.f32.vlgmr.msra.gmra.mxu2 %vm41_vm0, %v253_v39  ;;  %157 = vmatmul.msk.f32.vlgmr.msra.gmra.mxu3 %vm42_vm1, %v253_v39 }
  0x82   :  { %v35_v40 = vpop.permute.xlu0 %34 }
  0x83   :  { %vm39_vm2 = vcmp.eq.s32.totalorder %v31_v36, %v35_v40  ;;  %vm40_vm3 = vcmp.eq.s32.totalorder %v32_v37, %v35_v40 }
  0x84   :  { %154 = vmatmul.msk.f32.vlgmr.msra.gmra.mxu0 %vm39_vm2, %v253_v39  ;;  %156 = vmatmul.msk.f32.vlgmr.msra.gmra.mxu1 %vm40_vm3, %v253_v39 }
  0xff   :  { %v103_v41 = vpop.f32.mrf.mxu2  ;;  %v126_v42 = vpop.f32.mrf.mxu3 }
 0x100   :  { %v127_v43 = vadd.f32 %v126_v42, %v103_v41 }
 0x101   :  { %v100_v44 = vpop.f32.mrf.mxu0  ;;  %v123_v45 = vpop.f32.mrf.mxu1 }
 0x102   :  { %130 = vst [vmem:[#allocation5 + $0x8] sm:$0xff] %v127_v43  ;;  %v124_v46 = vadd.f32 %v123_v45, %v100_v44 }
 0x104   :  { %129 = vst [vmem:[#allocation5] sm:$0xff] %v124_v46 }
 0x105   :  { %143 = dma.vmem_to_hbm [thread:$0]  %s136_s19, 256, %s138_s22, [#allocation4], %s250_s14, %s250_s14, %s251_s15  }
 0x106   :  { %247 = dma.done.wait [#allocation4], 256  }
 0x107   :  { %248 = vsyncadd [#allocation4], 4294967040 }
 0x108   :  { %148 = vsyncpa [#allocation3], 1 }
 0x109   :  { %149 = vsyncpa [#allocation4], 1 }

</bundles_post_ra>
